<compile_context>
chip_gen: v7x
topology: tpu7x:2x2x1
jax: 0.10.0
libtpu: 0.0.40
codegen_flags: <defaults>
</compile_context>

<pallas_src>
import functools

import jax
import jax.numpy as jnp
from jax.experimental import pallas as pl
from jax.experimental.pallas import tpu as pltpu


def factor_encoder_kernel(y_ref, e_ref, wpt_ref, wmut_ref, bmu_ref,
                          wsigt_ref, bsig_ref, mu_ref, sigma_ref, *, bt, n):
    # ---- PortfolioLayer, Bt samples folded into one MXU matmul ----
    # scores[b*n + i, m] = sum_d e[b, i, d] * w_p^T[d, m]
    scores = jnp.dot(e_ref[...], wpt_ref[...],
                     preferred_element_type=jnp.float32)            # (Bt*N, M)
    m = scores.shape[-1]
    scores = scores.reshape(bt, n, m)                               # layout-free (N % 8 == 0)

    # Numerically-stable softmax over stocks (axis 1). b_p is a per-portfolio
    # constant -> softmax-invariant -> dropped entirely.
    scores = scores - jnp.max(scores, axis=1, keepdims=True)
    p = jnp.exp(scores)                                             # (Bt, N, M)
    denom = jnp.sum(p, axis=1)                                      # (Bt, M)

    # y_p on VPU (broadcast-mul) + XLU (sublane reduce) instead of a 1-row
    # matvec on the MXU; normalization deferred to the (Bt, M) vector.
    yp_unnorm = jnp.sum(y_ref[...] * p, axis=1)                     # (Bt, M)

    # EUP approx reciprocal + one Newton-Raphson step (full f32 accuracy).
    r = pl.reciprocal(denom, approx=True)
    r = r * (2.0 - denom * r)
    y_p = yp_unnorm * r                                             # (Bt, M)

    # ---- mapping layer heads (tiny MXU matmuls) ----
    mu_ref[...] = (jnp.dot(y_p, wmut_ref[...],
                           preferred_element_type=jnp.float32) + bmu_ref[...])
    sigma_ref[...] = jnp.exp(jnp.dot(y_p, wsigt_ref[...],
                                     preferred_element_type=jnp.float32)
                             + bsig_ref[...])


def factor_encoder(y, e, params, *, samples_per_step=32):
    """FactorEncoder forward.

    y: (N,) or (B, N) future stock returns
    e: (N, D) or (B, N, D) latent stock features
    Returns (mu, sigma) of shape (K,) each (or (B, K) if batched).
    """
    batched = y.ndim == 2
    if not batched:
        y = y[None]
        e = e[None]
    B, N = y.shape
    D = e.shape[-1]
    M = params["w_p"].shape[0]
    K = params["w_mu"].shape[0]

    # Fold Bt samples into each grid step; keep >= 2 parallel steps when B >= 2
    # so both v7x TensorCores get work (single step on B == 1).
    if B == 1:
        num_steps, bt = 1, 1
    else:
        num_steps = max(2, pl.cdiv(B, samples_per_step))
        bt = pl.cdiv(B, num_steps)
        num_steps = pl.cdiv(B, bt)
    b_pad = num_steps * bt

    y_f = y.astype(jnp.float32)
    e_f = e.astype(jnp.float32)
    if b_pad != B:
        # Zero padding is benign: scores=0 -> uniform softmax, y=0 -> y_p=0;
        # padded rows are sliced off below.
        y_f = jnp.concatenate([y_f, jnp.zeros((b_pad - B, N), jnp.float32)], 0)
        e_f = jnp.concatenate([e_f, jnp.zeros((b_pad - B, N, D), jnp.float32)], 0)

    y3 = y_f.reshape(b_pad, N, 1)      # stocks on sublanes -> broadcasts vs (Bt, N, M)
    e2 = e_f.reshape(b_pad * N, D)     # one (Bt*N, D) @ (D, M) matmul per step

    # One-time weight layout plumbing (outside the kernel): transpose so every
    # in-kernel matmul contracts lane-with-sublane. b_p intentionally unused.
    wpt = params["w_p"].T.astype(jnp.float32)                        # (D, M)
    wmut = params["w_mu"].T.astype(jnp.float32)                      # (M, K)
    bmu = params["b_mu"].reshape(1, K).astype(jnp.float32)           # (1, K)
    wsigt = params["w_sig"].T.astype(jnp.float32)                    # (M, K)
    bsig = params["b_sig"].reshape(1, K).astype(jnp.float32)         # (1, K)

    grid_spec = pltpu.PrefetchScalarGridSpec(
        num_scalar_prefetch=0,
        grid=(num_steps,),
        in_specs=[
            pl.BlockSpec((bt, N, 1), lambda s: (s, 0, 0)),      # y   (Bt samples)
            pl.BlockSpec((bt * N, D), lambda s: (s, 0)),        # e   (Bt samples, flat)
            pl.BlockSpec((D, M), lambda s: (0, 0)),             # w_p^T   (resident)
            pl.BlockSpec((M, K), lambda s: (0, 0)),             # w_mu^T  (resident)
            pl.BlockSpec((1, K), lambda s: (0, 0)),             # b_mu
            pl.BlockSpec((M, K), lambda s: (0, 0)),             # w_sig^T (resident)
            pl.BlockSpec((1, K), lambda s: (0, 0)),             # b_sig
        ],
        out_specs=[
            pl.BlockSpec((None, bt, K), lambda s: (s, 0, 0)),   # mu    (Bt, K)/step
            pl.BlockSpec((None, bt, K), lambda s: (s, 0, 0)),   # sigma (Bt, K)/step
        ],
    )

    mu, sigma = pl.pallas_call(
        functools.partial(factor_encoder_kernel, bt=bt, n=N),
        out_shape=(jax.ShapeDtypeStruct((num_steps, bt, K), jnp.float32),
                   jax.ShapeDtypeStruct((num_steps, bt, K), jnp.float32)),
        grid_spec=grid_spec,
        compiler_params=pltpu.CompilerParams(
            dimension_semantics=("parallel",)),
    )(y3, e2, wpt, wmut, bmu, wsigt, bsig)

    mu = mu.reshape(b_pad, K)[:B]
    sigma = sigma.reshape(b_pad, K)[:B]
    if not batched:
        mu, sigma = mu[0], sigma[0]
    return mu, sigma


def init_params(key, input_size, hidden_size, latent_size):
    kp, kb, kmu1, kmu2, ks1, ks2 = jax.random.split(key, 6)
    M, D, K = hidden_size, input_size, latent_size
    bound = 1.0 / (M ** 0.5)
    return {
        # PortfolioLayer: torch.randn init
        "w_p": jax.random.normal(kp, (M, D), jnp.float32),
        "b_p": jax.random.normal(kb, (M, 1), jnp.float32),
        # Linear(hidden_size, latent_size): uniform(-1/sqrt(fan_in), 1/sqrt(fan_in))
        "w_mu": jax.random.uniform(kmu1, (K, M), jnp.float32, -bound, bound),
        "b_mu": jax.random.uniform(kmu2, (K,), jnp.float32, -bound, bound),
        "w_sig": jax.random.uniform(ks1, (K, M), jnp.float32, -bound, bound),
        "b_sig": jax.random.uniform(ks2, (K,), jnp.float32, -bound, bound),
    }


def _reference(y, e, params):
    """Pure-JAX reference mirroring the PyTorch module (single sample)."""
    scores = params["w_p"] @ e.T + params["b_p"]            # (M, N)
    a_p = jax.nn.softmax(scores, axis=-1)
    y_p = a_p @ y                                           # (M,)
    mu = params["w_mu"] @ y_p + params["b_mu"].reshape(-1)
    sigma = jnp.exp(params["w_sig"] @ y_p + params["b_sig"].reshape(-1))
    return mu, sigma


if __name__ == "__main__":
    # small shapes: N=16 stocks, input_size D=32, hidden_size M=32 portfolios,
    # latent_size K=8 factors, batch of B=4 encoder invocations
    N, D, M, K, B = 16, 32, 32, 8, 4

    key = jax.random.PRNGKey(0)
    k_y, k_e, k_p = jax.random.split(key, 3)

    y_b = jax.random.normal(k_y, (B, N), jnp.float32)       # future stock returns
    e_b = jax.random.normal(k_e, (B, N, D), jnp.float32)    # latent stock features
    params = init_params(k_p, input_size=D, hidden_size=M, latent_size=K)

    # batched call: B=4 folds into 2 grid steps of Bt=2 samples (both v7x TCs busy)
    mu_b, sigma_b = factor_encoder(y_b, e_b, params)
    jax.block_until_ready((mu_b, sigma_b))
    assert mu_b.shape == (B, K) and sigma_b.shape == (B, K)

    mu_ref_b, sigma_ref_b = jax.vmap(_reference, in_axes=(0, 0, None))(y_b, e_b, params)
    assert jnp.allclose(mu_b, mu_ref_b, atol=1e-5, rtol=1e-5)
    assert jnp.allclose(sigma_b, sigma_ref_b, atol=1e-5, rtol=1e-5)

    # single-sample call (matches original module signature)
    mu_1, sigma_1 = factor_encoder(y_b[0], e_b[0], params)
    jax.block_until_ready((mu_1, sigma_1))
    mu_ref_1, sigma_ref_1 = _reference(y_b[0], e_b[0], params)
    assert mu_1.shape == (K,) and sigma_1.shape == (K,)
    assert jnp.allclose(mu_1, mu_ref_1, atol=1e-5, rtol=1e-5)
    assert jnp.allclose(sigma_1, sigma_ref_1, atol=1e-5, rtol=1e-5)

    print("KERNEL_OK")
</pallas_src>

<mosaic_0001>
module attributes {stable_mosaic.version = 11 : i64} {
  func.func @factor_encoder_kernel(%arg0: i32, %arg1: memref<2x16x1xf32, #tpu.memory_space<vmem>>, %arg2: memref<32x32xf32, #tpu.memory_space<vmem>>, %arg3: memref<32x32xf32, #tpu.memory_space<vmem>>, %arg4: memref<32x8xf32, #tpu.memory_space<vmem>>, %arg5: memref<1x8xf32, #tpu.memory_space<vmem>>, %arg6: memref<32x8xf32, #tpu.memory_space<vmem>>, %arg7: memref<1x8xf32, #tpu.memory_space<vmem>>, %arg8: memref<1x2x8xf32, #tpu.memory_space<vmem>>, %arg9: memref<1x2x8xf32, #tpu.memory_space<vmem>>) attributes {dimension_semantics = [#tpu.dimension_semantics<parallel>], iteration_bounds = array<i64: 2>, scalar_prefetch = 0 : i64, scratch_operands = 0 : i64, tpu.core_type = #tpu.core_type<tc>, window_params = [{transform_indices = @transform_0, window_bounds = array<i64: 2, 16, 1>}, {transform_indices = @transform_1, window_bounds = array<i64: 32, 32>}, {pipeline_mode = #tpu.pipeline_mode<synchronous>, transform_indices = @transform_2, window_bounds = array<i64: 32, 32>}, {pipeline_mode = #tpu.pipeline_mode<synchronous>, transform_indices = @transform_3, window_bounds = array<i64: 32, 8>}, {pipeline_mode = #tpu.pipeline_mode<synchronous>, transform_indices = @transform_4, window_bounds = array<i64: 1, 8>}, {pipeline_mode = #tpu.pipeline_mode<synchronous>, transform_indices = @transform_5, window_bounds = array<i64: 32, 8>}, {pipeline_mode = #tpu.pipeline_mode<synchronous>, transform_indices = @transform_6, window_bounds = array<i64: 1, 8>}, {transform_indices = @transform_7, window_bounds = array<i64: 1, 2, 8>}, {transform_indices = @transform_8, window_bounds = array<i64: 1, 2, 8>}]} {
    %c0 = arith.constant 0 : index
    %c0_0 = arith.constant 0 : index
    %0 = vector.load %arg2[%c0, %c0_0] : memref<32x32xf32, #tpu.memory_space<vmem>>, vector<32x32xf32>
    %c0_1 = arith.constant 0 : index
    %c0_2 = arith.constant 0 : index
    %1 = vector.load %arg3[%c0_1, %c0_2] : memref<32x32xf32, #tpu.memory_space<vmem>>, vector<32x32xf32>
    %cst = arith.constant dense<0.000000e+00> : vector<32x32xf32>
    %2 = tpu.matmul %0, %1, %cst {dimension_numbers = #tpu.dot_dimension_numbers<[1], [0], [0], [1], [0, 0, 1, 1], [], []>} : vector<32x32xf32>, vector<32x32xf32>, vector<32x32xf32> -> vector<32x32xf32>
    %3 = vector.shape_cast %2 : vector<32x32xf32> to vector<2x16x32xf32>
    %cst_3 = arith.constant dense<0xFF800000> : vector<2x32xf32>
    %4 = vector.multi_reduction <maximumf>, %3, %cst_3 [1] : vector<2x16x32xf32> to vector<2x32xf32>
    %5 = vector.shape_cast %4 : vector<2x32xf32> to vector<2x1x32xf32>
    %6 = vector.broadcast %5 : vector<2x1x32xf32> to vector<2x16x32xf32>
    %7 = arith.subf %3, %6 : vector<2x16x32xf32>
    %8 = math.exp %7 : vector<2x16x32xf32>
    %cst_4 = arith.constant dense<0.000000e+00> : vector<2x32xf32>
    %9 = vector.multi_reduction <add>, %8, %cst_4 [1] : vector<2x16x32xf32> to vector<2x32xf32>
    %c0_5 = arith.constant 0 : index
    %c0_6 = arith.constant 0 : index
    %c0_7 = arith.constant 0 : index
    %10 = vector.load %arg1[%c0_5, %c0_6, %c0_7] : memref<2x16x1xf32, #tpu.memory_space<vmem>>, vector<2x16x1xf32>
    %11 = vector.broadcast %10 : vector<2x16x1xf32> to vector<2x16x32xf32>
    %12 = arith.mulf %11, %8 : vector<2x16x32xf32>
    %cst_8 = arith.constant dense<0.000000e+00> : vector<2x32xf32>
    %13 = vector.multi_reduction <add>, %12, %cst_8 [1] : vector<2x16x32xf32> to vector<2x32xf32>
    %14 = tpu.reciprocal %9 {approx = true} : vector<2x32xf32> -> vector<2x32xf32>
    %15 = arith.mulf %9, %14 : vector<2x32xf32>
    %cst_9 = arith.constant 2.000000e+00 : f32
    %16 = vector.broadcast %cst_9 : f32 to vector<2x32xf32>
    %17 = arith.subf %16, %15 : vector<2x32xf32>
    %18 = arith.mulf %14, %17 : vector<2x32xf32>
    %19 = arith.mulf %13, %18 : vector<2x32xf32>
    %c0_10 = arith.constant 0 : index
    %c0_11 = arith.constant 0 : index
    %20 = vector.load %arg4[%c0_10, %c0_11] : memref<32x8xf32, #tpu.memory_space<vmem>>, vector<32x8xf32>
    %cst_12 = arith.constant dense<0.000000e+00> : vector<2x8xf32>
    %21 = tpu.matmul %19, %20, %cst_12 {dimension_numbers = #tpu.dot_dimension_numbers<[1], [0], [0], [1], [0, 0, 1, 1], [], []>} : vector<2x32xf32>, vector<32x8xf32>, vector<2x8xf32> -> vector<2x8xf32>
    %c0_13 = arith.constant 0 : index
    %c0_14 = arith.constant 0 : index
    %22 = vector.load %arg5[%c0_13, %c0_14] : memref<1x8xf32, #tpu.memory_space<vmem>>, vector<1x8xf32>
    %23 = vector.broadcast %22 : vector<1x8xf32> to vector<2x8xf32>
    %24 = arith.addf %21, %23 : vector<2x8xf32>
    %c0_15 = arith.constant 0 : index
    %c0_16 = arith.constant 0 : index
    %c0_17 = arith.constant 0 : index
    %25 = vector.load %arg8[%c0_15, %c0_16, %c0_17] : memref<1x2x8xf32, #tpu.memory_space<vmem>>, vector<1x2x8xf32>
    %26 = vector.shape_cast %25 : vector<1x2x8xf32> to vector<2x8xf32>
    %27 = vector.shape_cast %24 : vector<2x8xf32> to vector<1x2x8xf32>
    tpu.vector_store %arg8[%c0_15, %c0_16, %c0_17], %27 {strides = array<i32>} : memref<1x2x8xf32, #tpu.memory_space<vmem>>, vector<1x2x8xf32>,
    %c0_18 = arith.constant 0 : index
    %c0_19 = arith.constant 0 : index
    %28 = vector.load %arg6[%c0_18, %c0_19] : memref<32x8xf32, #tpu.memory_space<vmem>>, vector<32x8xf32>
    %cst_20 = arith.constant dense<0.000000e+00> : vector<2x8xf32>
    %29 = tpu.matmul %19, %28, %cst_20 {dimension_numbers = #tpu.dot_dimension_numbers<[1], [0], [0], [1], [0, 0, 1, 1], [], []>} : vector<2x32xf32>, vector<32x8xf32>, vector<2x8xf32> -> vector<2x8xf32>
    %c0_21 = arith.constant 0 : index
    %c0_22 = arith.constant 0 : index
    %30 = vector.load %arg7[%c0_21, %c0_22] : memref<1x8xf32, #tpu.memory_space<vmem>>, vector<1x8xf32>
    %31 = vector.broadcast %30 : vector<1x8xf32> to vector<2x8xf32>
    %32 = arith.addf %29, %31 : vector<2x8xf32>
    %33 = math.exp %32 : vector<2x8xf32>
    %c0_23 = arith.constant 0 : index
    %c0_24 = arith.constant 0 : index
    %c0_25 = arith.constant 0 : index
    %34 = vector.load %arg9[%c0_23, %c0_24, %c0_25] : memref<1x2x8xf32, #tpu.memory_space<vmem>>, vector<1x2x8xf32>
    %35 = vector.shape_cast %34 : vector<1x2x8xf32> to vector<2x8xf32>
    %36 = vector.shape_cast %33 : vector<2x8xf32> to vector<1x2x8xf32>
    tpu.vector_store %arg9[%c0_23, %c0_24, %c0_25], %36 {strides = array<i32>} : memref<1x2x8xf32, #tpu.memory_space<vmem>>, vector<1x2x8xf32>,
    return
  }
  func.func @transform_0(%arg0: i32) -> (i32, i32, i32) {
    %c0_i32 = arith.constant 0 : i32
    %c0_i32_0 = arith.constant 0 : i32
    %c0_i32_1 = arith.constant 0 : i32
    return %arg0, %c0_i32, %c0_i32_0 : i32, i32, i32
  }
  func.func @transform_1(%arg0: i32) -> (i32, i32) {
    %c0_i32 = arith.constant 0 : i32
    %c0_i32_0 = arith.constant 0 : i32
    return %arg0, %c0_i32 : i32, i32
  }
  func.func @transform_2(%arg0: i32) -> (i32, i32) {
    %c0_i32 = arith.constant 0 : i32
    %c0_i32_0 = arith.constant 0 : i32
    %c0_i32_1 = arith.constant 0 : i32
    return %c0_i32, %c0_i32_0 : i32, i32
  }
  func.func @transform_3(%arg0: i32) -> (i32, i32) {
    %c0_i32 = arith.constant 0 : i32
    %c0_i32_0 = arith.constant 0 : i32
    %c0_i32_1 = arith.constant 0 : i32
    return %c0_i32, %c0_i32_0 : i32, i32
  }
  func.func @transform_4(%arg0: i32) -> (i32, i32) {
    %c0_i32 = arith.constant 0 : i32
    %c0_i32_0 = arith.constant 0 : i32
    %c0_i32_1 = arith.constant 0 : i32
    return %c0_i32, %c0_i32_0 : i32, i32
  }
  func.func @transform_5(%arg0: i32) -> (i32, i32) {
    %c0_i32 = arith.constant 0 : i32
    %c0_i32_0 = arith.constant 0 : i32
    %c0_i32_1 = arith.constant 0 : i32
    return %c0_i32, %c0_i32_0 : i32, i32
  }
  func.func @transform_6(%arg0: i32) -> (i32, i32) {
    %c0_i32 = arith.constant 0 : i32
    %c0_i32_0 = arith.constant 0 : i32
    %c0_i32_1 = arith.constant 0 : i32
    return %c0_i32, %c0_i32_0 : i32, i32
  }
  func.func @transform_7(%arg0: i32) -> (i32, i32, i32) {
    %c0_i32 = arith.constant 0 : i32
    %c0_i32_0 = arith.constant 0 : i32
    %c0_i32_1 = arith.constant 0 : i32
    return %arg0, %c0_i32, %c0_i32_0 : i32, i32, i32
  }
  func.func @transform_8(%arg0: i32) -> (i32, i32, i32) {
    %c0_i32 = arith.constant 0 : i32
    %c0_i32_0 = arith.constant 0 : i32
    %c0_i32_1 = arith.constant 0 : i32
    return %arg0, %c0_i32, %c0_i32_0 : i32, i32, i32
  }
}

</mosaic_0001>

<bundles_post_ra>
// kernel: tpu_custom_call.1
= control target key start
LH: loop header
LB: loop body
LE: loop exit
PB: predicated region body
PF: predicated region fallthrough
CT: control target
= control target key end

     0   :  { %14 = vsyncpa [#allocation3], 0  ;;  %s1377_s0 = inlined_call_operand.vmem [shape: f32[4,16,1], index: 0, kind: input, shape index: {}]   ;;  %s1378_s1 = inlined_call_operand.vmem [shape: f32[64,32], index: 1, kind: input, shape index: {}]   ;;  %s1379_s2 = inlined_call_operand.vmem [shape: f32[32,32], index: 2, kind: input, shape index: {}]   ;;  %s1380_s3 = inlined_call_operand.vmem [shape: f32[32,8], index: 3, kind: input, shape index: {}]   ;;  %s1381_s4 = inlined_call_operand.vmem [shape: f32[1,8], index: 4, kind: input, shape index: {}]   ;;  %s1382_s5 = inlined_call_operand.vmem [shape: f32[32,8], index: 5, kind: input, shape index: {}]   ;;  %s1383_s6 = inlined_call_operand.vmem [shape: f32[1,8], index: 6, kind: input, shape index: {}]   ;;  %s1384_s7 = inlined_call_operand.hbm [shape: f32[2,2,8], index: 7, kind: output, shape index: {0}]   ;;  %s1385_s8 = inlined_call_operand.hbm [shape: f32[2,2,8], index: 8, kind: output, shape index: {1}]  }
   0x1   :  { %16 = vsyncpa [#allocation3 + $0x1], 0 }
   0x2   :  { %17 = vsyncpa [#allocation5], 0 }
   0x3   :  { %19 = vsyncpa [#allocation5 + $0x1], 0  ;;  %s1171_s27 = smov 0   ;;  %s1173_s28 = smov 0  }
   0x4   :  { %s1175_s29 = smov 0   ;;  %s1177_s30 = smov 0  }
   0x5 LB: > { %s1192_s9 = sadd.s32 4294967295, %s1118_s30   ;;  %s860_s10 = sadd.s32 4294967294, %s1118_s30   ;;  %s1118_s30 = sphi %s1177_s30, %s1393_s30   ;;  %s1114_s29 = sphi %s1175_s29, %s1392_s29   ;;  %s1110_s28 = sphi %s1173_s28, %s1391_s28   ;;  %s1106_s27 = sphi %s1171_s27, %s1390_s27  }
   0x6   : > { %s1196_s11 = sadd.s32 1, %s1118_s30   ;;  %s189_s12 = sadd.s32 1, %s1114_s29 }
   0x7   : > { %s186_s13 = ssub.s32 %s1118_s30, %s1196_s11  ;;  %p199_p0 = scmp.ne.s32.totalorder %s1114_s29, %s1110_s28 }
   0x8   : > { %p187_p1 = scmp.eq.s32.totalorder %s186_s13, 0  ;;  %p200_p2 = scmp.eq.s32.totalorder %s1192_s9, 1 }
   0x9   : > { %p205_p3 = scmp.ne.s32.totalorder %s1110_s28, %s1106_s27  ;;  %p206_p4 = scmp.eq.s32.totalorder %s860_s10, 1 }
   0xa   : > { %s1207_s14 = scalar_select %p187_p1, %s1114_s29, %s189_s12  }
   0xb   : > { %p1209_p5 = por %p200_p2, %p199_p0  ;;  %p1213_p6 = por %p206_p4, %p205_p3 }
   0xc   : > { %p863_p7 = scmp.ge.s32.totalorder %s1118_s30, 1  ;;  %p284_p8 = scmp.lt.s32.totalorder %s1118_s30, 3 }
   0xe   : > { %p285_p9 = pnand %p863_p7, %p284_p8 }
   0xf   : > { %v346_v0 = vld [vmem:[%s1379_s2] sm:$0xff] (!%p285_p9)  ;;  %v347_v1 = vld [vmem:[%s1379_s2 + $0x8] sm:$0xff] (!%p285_p9)  ;;  %v348_v2 = vld [vmem:[%s1379_s2 + $0x10] sm:$0xff] (!%p285_p9)  ;;  %s869_s23 = sshll.u32 (!%p285_p9), %s1192_s9, 2  ;;  %v1120_v5 = vmov (!%p285_p9), 0   ;;  %s866_s26 = sshll.u32 (!%p285_p9), %s1192_s9, 1 }
  0x10   : > { %288 = sbr.rel (%p285_p9) target bundleno = 564 (0x234), region = 48  ;;  %v940_v3 = vpack.c.bf16 (!%p285_p9), %v347_v1, %v346_v0  ;;  %v349_v4 = vld [vmem:[%s1379_s2 + $0x18] sm:$0xff] (!%p285_p9)  ;;  %p337_p10 = scmp.lt.s32.totalorder (!%p285_p9), %s869_s23, 7  ;;  %1008 = vset.pattern.permute.xlu0 (!%p285_p9), %v1120_v5  ;;  %1009 = vset.pattern.permute.xlu1 (!%p285_p9), %v1120_v5  ;;  %vm350_vm0 = vcmask (!%p285_p9), 261120   ;;  %v641_v15 = vld [vmem:[%s1382_s5] sm:$0xff] (!%p285_p9)  ;;  %v642_v16 = vld [vmem:[%s1382_s5 + $0x8] sm:$0xff] (!%p285_p9) }
  0x11   : > { %v944_v6 = vpack.c.bf16 (!%p285_p9), %v349_v4, %v348_v2  ;;  %p330_p11 = scmp.lt.s32.totalorder (!%p285_p9), %s866_s26, 3  ;;  %v552_v17 = vld [vmem:[%s1380_s3] sm:$0xff] (!%p285_p9)  ;;  %v1121_v18 = vmov (!%p285_p9), 0.0|0.0   ;;  %v955_v19 = vpack.c.bf16 (!%p285_p9), %v642_v16, %v641_v15  ;;  %v553_v20 = vld [vmem:[%s1380_s3 + $0x8] sm:$0xff] (!%p285_p9)  ;;  %v643_v21 = vld [vmem:[%s1382_s5 + $0x10] sm:$0xff] (!%p285_p9)  ;;  %vm1122_vm1 = vmmov (!%p285_p9), 0  }
  0x12   : > { %941 = vmatprep.subr.bf16.mxu0 (!%p285_p9), %v940_v3  ;;  %948 = vmatprep.subr.bf16.mxu1 (!%p285_p9), %v1121_v18  ;;  %v644_v22 = vld [vmem:[%s1382_s5 + $0x18] sm:$0xff] (!%p285_p9)  ;;  %v949_v23 = vpack.c.bf16 (!%p285_p9), %v553_v20, %v552_v17  ;;  %v554_v24 = vld [vmem:[%s1380_s3 + $0x10] sm:$0xff] (!%p285_p9)  ;;  %v1123_v26 = vmov (!%p285_p9), 0.0   ;;  %vm565_vm2 = vcmask (!%p285_p9), 1041409   ;;  %s1282_s25 = sand.u32 (!%p285_p9), 1, %s1110_s28   ;;  %vm639_vm3 = vcmask (!%p285_p9), 58368  }
  0x13   : > { %943 = vmatpush3.bf16.msra.mxu0 (!%p285_p9), %v940_v3  ;;  %v555_v25 = vld [vmem:[%s1380_s3 + $0x18] sm:$0xff] (!%p285_p9)  ;;  %926 = vmatprep.mubr.msk.f32.mxu1 (!%p285_p9), %vm1122_vm1, %v1123_v26  ;;  %v958_v27 = vpack.c.bf16 (!%p285_p9), %v644_v22, %v643_v21  ;;  %s726_s24 = scalar_lea.sflag (!%p285_p9), [#allocation3], %s1282_s25  ;;  %s1124_s12 = smov (!%p285_p9), [#allocation2]  }
  0x14   : > { %945 = vmatprep.subr.bf16.mxu0 (!%p285_p9), %v944_v6  ;;  %950 = vmatpush3.bf16.msra.mxu1 (!%p285_p9), %v949_v23  ;;  %v952_v28 = vpack.c.bf16 (!%p285_p9), %v555_v25, %v554_v24  ;;  %s1028_s13 = sshll.u32 (!%p285_p9), %s1124_s12, 4  ;;  %s1029_s13 = int_to_ptr.vmem [resolvable:$false] %s1028_s13 }
  0x15   : > { %951 = vmatprep.subr.bf16.mxu1 (!%p285_p9), %v1121_v18 }
  0x17   : > { %s1395_s23 = smov (!%p337_p10, %s869_s23), 7  ;;  %s1397_s26 = smov (!%p330_p11, %s866_s26), 3  ;;  %947 = vmatpush3.bf16.msra.mxu0 %v944_v6 }
  0x18   : > { %s870_s10 = sshll.u32 %s1395_s23, 3  ;;  %s885_s18 = sshll.u32 %s1397_s26, 4  ;;  %954 = vmatprep.subr.bf16.mxu0 %v1121_v18  ;;  %953 = vmatpush3.bf16.msra.mxu1 %v952_v28 }
  0x19   : > { %s340_s17 = scalar_lea.vmem %s1378_s1, %s870_s10  ;;  %s334_s21 = scalar_lea.vmem %s1377_s0, %s885_s18 }
  0x1a   : > { %v342_v7 = vld [vmem:[%s340_s17] sm:$0xff]  ;;  %v343_v8 = vld [vmem:[%s340_s17 + $0x8] sm:$0xff]  ;;  %v498_v10 = vld [vmem:[%s334_s21 + $0x10] sm:$0xff]  ;;  %s864_s26 = sshll.u32 %s1282_s25, 1  ;;  %s1386_s18 = sshll.u32 %s1192_s9, 5 }
  0x1b   : > { %912 = vmatprep.mubr.msk.f32.mxu0 %vm350_vm0, %v342_v7  ;;  %v496_v9 = vld [vmem:[%s334_s21] sm:$0xff]  ;;  %v344_v11 = vld [vmem:[%s340_s17 + $0x10] sm:$0xff]  ;;  %512 = vperm.xlu1 %1009, %v498_v10   ;;  %v497_v12 = vld [vmem:[%s334_s21 + $0x8] sm:$0xff]  ;;  %s321_s19 = scalar_lea.vmem [#allocation2], %s864_s26  ;;  %s1299_s23 = scalar_lea.hbm %s1384_s7, %s1386_s18 }
  0x1c   : > { %502 = vperm.xlu0 %1008, %v496_v9   ;;  %v499_v13 = vld [vmem:[%s334_s21 + $0x18] sm:$0xff]  ;;  %913 = vmatmul.mubr.msk.f32.vlgmr.msra.gmra.mrb[0].mxu0 %vm350_vm0, %v343_v8  ;;  %s744_s20 = sshll.u32 %s321_s19, 4  ;;  %s1301_s20 = int_to_ptr.vmem [resolvable:$true] %s744_s20 }
  0x1d   : > { %915 = vmatprep.mubr.msk.f32.mxu0 %vm350_vm0, %v344_v11  ;;  %v345_v14 = vld [vmem:[%s340_s17 + $0x18] sm:$0xff]  ;;  %956 = vmatpush3.bf16.msra.mxu0 %v955_v19  ;;  %s1024_s10 = scalar_lea.vmem %s1301_s20, 32  ;;  %s1030_s17 = scalar_lea.vmem %s1029_s13, 64 }
  0x1e   : > { %957 = vmatprep.subr.bf16.mxu0 %v1121_v18  ;;  %p1025_p12 = scmp.ne.s32.totalorder %s1301_s20, %s1024_s10  ;;  %p1031_p1 = scmp.lt.s32.totalorder %s1301_s20, %s1029_s13 }
  0x1f   : > { %517 = vperm.xlu1 %1009, %v499_v13   ;;  %p1032_p2 = scmp.lt.s32.totalorder %s1030_s17, %s1024_s10 }
  0x20   : > { %507 = vperm.xlu0 %1008, %v497_v12   ;;  %916 = vmatmul.mubr.msk.f32.gmra.mrb[2].mxu0 %vm350_vm0, %v345_v14  ;;  %p1026_p13 = pnand %p1025_p12, %p1209_p5 }
  0x21   : > { %937 = vmatprep.mubr.msk.f32.mxu0 %vm1122_vm1, %v1123_v26  ;;  %959 = vmatpush3.bf16.msra.mxu0 %v958_v27  ;;  %p1033_p3 = por %p1032_p2, %p1031_p1 }
  0x22   : > { %p1027_p0 = pneg %p1026_p13 }
  0x24   : > { %p1034_p4 = pnand %p1033_p3, %p1027_p0 }
  0x9a   : > { %v513_v60 = vpop.permute.xlu1 %512 }
  0x9b   : > { %v503_v59 = vpop.permute.xlu0 %502 }
  0x9e   : > { %v518_v6 = vpop.permute.xlu1 %517 }
  0x9f   : > { %v508_v61 = vpop.permute.xlu0 %507 }
  0xef   : > { %v914_v29 = vpop.f32.mrb[0].mxu0 }
  0xf0   : > { %v449_v30 = vsel %vm350_vm0, %v914_v29, -inf  ;;  %v429_v31 = vpop.f32.mrb[1].mxu0 }
  0xf1   : > { %v448_v32 = vsel %vm350_vm0, %v429_v31, -inf }
  0xf2   : > { %v450_v33 = vmax.f32 %v448_v32, %v449_v30 }
  0xf3   : > { %v917_v34 = vpop.f32.mrb[2].mxu0 }
  0xf4   : > { %v451_v35 = vrot.slane %v450_v33, 4  ;;  %v458_v36 = vsel %vm350_vm0, %v917_v34, -inf  ;;  %v439_v37 = vpop.f32.mrb[3].mxu0 }
  0xf5   : > { %v457_v38 = vsel %vm350_vm0, %v439_v37, -inf }
  0xf6   : > { %v452_v39 = vmax.f32 %v450_v33, %v451_v35  ;;  %v459_v40 = vmax.f32 %v457_v38, %v458_v36 }
  0xf8   : > { %v453_v41 = vrot.slane %v452_v39, 2  ;;  %v460_v42 = vrot.slane %v459_v40, 4 }
  0xfa   : > { %v454_v43 = vmax.f32 %v452_v39, %v453_v41  ;;  %v461_v44 = vmax.f32 %v459_v40, %v460_v42 }
  0xfc   : > { %v455_v45 = vrot.slane %v454_v43, 1  ;;  %v462_v46 = vrot.slane %v461_v44, 2 }
  0xfe   : > { %v456_v47 = vmax.f32 %v454_v43, %v455_v45  ;;  %v463_v48 = vmax.f32 %v461_v44, %v462_v46 }
 0x100   : > { %v466_v49 = vsub.f32 %v429_v31, %v456_v47  ;;  %v467_v50 = vsub.f32 %v914_v29, %v456_v47  ;;  %v464_v51 = vrot.slane %v463_v48, 1 }
 0x102   : > { %v470_v52 = vmul.f32 1.442695, %v466_v49  ;;  %v472_v53 = vmul.f32 1.442695, %v467_v50  ;;  %v465_v54 = vmax.f32 %v463_v48, %v464_v51 }
 0x104   : > { %1010 = vpow2.f32 %v470_v52  ;;  %v468_v55 = vsub.f32 %v439_v37, %v465_v54  ;;  %v469_v56 = vsub.f32 %v917_v34, %v465_v54  ;;  %v875_v54 = vld [vmem:[%s1381_s4] ss:$0 sm:$0xff] }
 0x105   : > { %1012 = vpow2.f32 %v472_v53 }
 0x106   : > { %v474_v57 = vmul.f32 1.442695, %v468_v55  ;;  %v476_v58 = vmul.f32 1.442695, %v469_v56  ;;  %v877_v55 = vld [vmem:[%s1383_s6] ss:$0 sm:$0xff] }
 0x108   : > { %1014 = vpow2.f32 %v474_v57 }
 0x109   : > { %1016 = vpow2.f32 %v476_v58 }
 0x10e   : > { %v1011_v62 = vpop.eup %1010 }
 0x10f   : > { %v1013_v63 = vpop.eup %1012  ;;  %v478_v0 = vsel %vm350_vm0, %v1011_v62, 0.0  ;;  %v520_v1 = vmul.f32 %v1011_v62, %v503_v59 }
 0x110   : > { %v479_v2 = vsel %vm350_vm0, %v1013_v63, 0.0  ;;  %v521_v3 = vmul.f32 %v1013_v63, %v508_v61 }
 0x111   : > { %v480_v4 = vadd.f32 %v479_v2, %v478_v0  ;;  %v524_v5 = vsel %vm350_vm0, %v520_v1, 0.0 }
 0x112   : > { %v1015_v7 = vpop.eup %1014  ;;  %v525_v8 = vsel %vm350_vm0, %v521_v3, 0.0 }
 0x113   : > { %v1017_v9 = vpop.eup %1016  ;;  %v481_v10 = vrot.slane %v480_v4, 4  ;;  %v487_v11 = vsel %vm350_vm0, %v1015_v7, 0.0  ;;  %v522_v12 = vmul.f32 %v1015_v7, %v513_v60  ;;  %v526_v13 = vadd.f32 %v525_v8, %v524_v5 }
 0x114   : > { %v488_v14 = vsel %vm350_vm0, %v1017_v9, 0.0  ;;  %v523_v15 = vmul.f32 %v1017_v9, %v518_v6 }
 0x115   : > { %v482_v16 = vadd.f32 %v481_v10, %v480_v4  ;;  %v489_v17 = vadd.f32 %v488_v14, %v487_v11  ;;  %v533_v18 = vsel %vm350_vm0, %v522_v12, 0.0  ;;  %v527_v25 = vrot.slane %v526_v13, 4 }
 0x116   : > { %v534_v19 = vsel %vm350_vm0, %v523_v15, 0.0 }
 0x117   : > { %v490_v20 = vrot.slane %v489_v17, 4  ;;  %v535_v21 = vadd.f32 %v534_v19, %v533_v18  ;;  %v483_v22 = vrot.slane %v482_v16, 2  ;;  %v528_v30 = vadd.f32 %v527_v25, %v526_v13 }
 0x119   : > { %v491_v23 = vadd.f32 %v490_v20, %v489_v17  ;;  %v484_v24 = vadd.f32 %v483_v22, %v482_v16  ;;  %v536_v31 = vrot.slane %v535_v21, 4  ;;  %v529_v34 = vrot.slane %v528_v30, 2 }
 0x11b   : > { %v485_v26 = vrot.slane %v484_v24, 1  ;;  %v492_v27 = vrot.slane %v491_v23, 2  ;;  %v537_v35 = vadd.f32 %v536_v31, %v535_v21  ;;  %v530_v36 = vadd.f32 %v529_v34, %v528_v30 }
 0x11d   : > { %v486_v28 = vadd.f32 %v485_v26, %v484_v24  ;;  %v493_v29 = vadd.f32 %v492_v27, %v491_v23  ;;  %v538_v37 = vrot.slane %v537_v35, 2  ;;  %v531_v39 = vrot.slane %v530_v36, 1 }
 0x11f   : > { %v494_v32 = vrot.slane %v493_v29, 1  ;;  %1018 = vrcp.f32 %v486_v28  ;;  %v539_v40 = vadd.f32 %v538_v37, %v537_v35  ;;  %v532_v44 = vadd.f32 %v531_v39, %v530_v36 }
 0x121   : > { %v495_v33 = vadd.f32 %v494_v32, %v493_v29  ;;  %v540_v45 = vrot.slane %v539_v40, 1 }
 0x123   : > { %1020 = vrcp.f32 %v495_v33  ;;  %v541_v50 = vadd.f32 %v540_v45, %v539_v40 }
 0x129   : > { %v1019_v38 = vpop.eup %1018 }
 0x12a   : > { %v544_v41 = vmul.f32 %v1019_v38, %v486_v28 }
 0x12c   : > { %v546_v42 = vsub.f32 2.0, %v544_v41 }
 0x12d   : > { %v1021_v43 = vpop.eup %1020 }
 0x12e   : > { %v545_v46 = vmul.f32 %v1021_v43, %v495_v33  ;;  %v548_v47 = vmul.f32 %v1019_v38, %v546_v42 }
 0x130   : > { %v547_v48 = vsub.f32 2.0, %v545_v46  ;;  %v550_v49 = vmul.f32 %v548_v47, %v532_v44 }
 0x132   : > { %v549_v51 = vmul.f32 %v1021_v43, %v547_v48 }
 0x134   : > { %v551_v52 = vmul.f32 %v549_v51, %v541_v50 }
 0x136   : > { %v566_v53 = vsel %vm565_vm2, %v551_v52, %v550_v49 }
 0x137   : > { %927 = vmatmul.mubr.msk.f32.vlgmr.msra.gmra.mrb[0].mxu1 %vm350_vm0, %v566_v53  ;;  %938 = vmatmul.mubr.msk.f32.vlgmr.msra.gmra.mrb[4].mxu0 %vm350_vm0, %v566_v53 }
 0x20a   : > { %v635_v56 = vpop.f32.mrb[0].mxu1  ;;  %v718_v57 = vpop.f32.mrb[4].mxu0 }
 0x20b   : > { %v636_v58 = vadd.f32 %v875_v54, %v635_v56  ;;  %v719_v59 = vadd.f32 %v877_v55, %v718_v57  ;;  %v928_v60 = vpop.f32.mrb[1].mxu1  ;;  %v939_v61 = vpop.f32.mrb[5].mxu0 }
 0x20d   : > { %v722_v62 = vmul.f32 1.442695, %v719_v59  ;;  %640 = vst.msk [vmem:[%s321_s19] sm:$0x3] %vm639_vm3, %v636_v58 }
 0x20e   : > { %1037 = shalt.err (!%p1034_p4)
}
 0x20f   : > { %s1038_s19 = scalar_lea.hbm %s1299_s23, 32  ;;  %s1042_s12 = scalar_lea.hbm %s1384_s7, 64 }
 0x210   : > { %p1039_p7 = scmp.ne.s32.totalorder %s1299_s23, %s1038_s19  ;;  %p1043_p10 = scmp.lt.u32.totalorder %s1299_s23, %s1384_s7 }
 0x211   : > { %p1044_p11 = scmp.lt.u32.totalorder %s1042_s12, %s1038_s19  ;;  %p1046_p13 = scmp.lt.u32.totalorder %s1038_s19, %s1299_s23 }
 0x212   : > { %p1040_p8 = pnand %p1039_p7, %p1209_p5 }
 0x213   : > { %p1045_p12 = por %p1044_p11, %p1043_p10 }
 0x214   : > { %p1041_p9 = pneg %p1040_p8 }
 0x215   : > { %p1047_p0 = por %p1046_p13, %p1045_p12 }
 0x217   : > { %p1048_p1 = pnand %p1047_p0, %p1041_p9 }
 0x219   : > { %1051 = shalt.err (!%p1048_p1)
}
 0x21a   : > { %960 = dma.vmem_to_hbm [thread:$0]  (%p1209_p5), %s1301_s20, 32, %s1299_s23, %s726_s24   ;;  %1022 = vpow2.f32 %v722_v62 }
 0x21b   : > { %s328_s10 = scalar_lea.vmem [#allocation4], %s864_s26  ;;  %s1389_s17 = sshll.u32 %s1192_s9, 5 }
 0x21c   : > { %s757_s18 = sshll.u32 %s328_s10, 4  ;;  %s1333_s19 = scalar_lea.hbm %s1385_s8, %s1389_s17  ;;  %s1335_s18 = int_to_ptr.vmem [resolvable:$true] %s757_s18 }
 0x21d   : > { %s731_s12 = scalar_lea.sflag [#allocation5], %s1282_s25  ;;  %s1052_s20 = scalar_lea.vmem %s1335_s18, 32 }
 0x21e   : > { %p1053_p2 = scmp.ne.s32.totalorder %s1335_s18, %s1052_s20  ;;  %s1125_s9 = smov [#allocation4]  }
 0x21f   : > { %s1056_s26 = sshll.u32 %s1125_s9, 4  ;;  %s1057_s26 = int_to_ptr.vmem [resolvable:$false] %s1056_s26 }
 0x220   : > { %p1054_p3 = pnand %p1053_p2, %p1209_p5  ;;  %s1058_s23 = scalar_lea.vmem %s1057_s26, 64 }
 0x221   : > { %p1059_p7 = scmp.lt.s32.totalorder %s1335_s18, %s1057_s26  ;;  %p1060_p8 = scmp.lt.s32.totalorder %s1058_s23, %s1052_s20 }
 0x222   : > { %p1055_p4 = pneg %p1054_p3 }
 0x223   : > { %p1061_p9 = por %p1060_p8, %p1059_p7 }
 0x224   : > { %v1023_v63 = vpop.eup %1022 }
 0x225   : > { %724 = vst.msk [vmem:[%s328_s10] sm:$0x3] %vm639_vm3, %v1023_v63  ;;  %p1062_p10 = pnand %p1061_p9, %p1055_p4 }
 0x227   : > { %1065 = shalt.err (!%p1062_p10)
}
 0x228   : > { %s1066_s25 = scalar_lea.hbm %s1333_s19, 32  ;;  %s1070_s10 = scalar_lea.hbm %s1385_s8, 64 }
 0x229   : > { %p1067_p11 = scmp.ne.s32.totalorder %s1333_s19, %s1066_s25  ;;  %p1071_p0 = scmp.lt.u32.totalorder %s1333_s19, %s1385_s8 }
 0x22a   : > { %p1072_p1 = scmp.lt.u32.totalorder %s1070_s10, %s1066_s25  ;;  %p1074_p3 = scmp.lt.u32.totalorder %s1066_s25, %s1333_s19 }
 0x22b   : > { %p1068_p12 = pnand %p1067_p11, %p1209_p5 }
 0x22c   : > { %p1073_p2 = por %p1072_p1, %p1071_p0 }
 0x22d   : > { %p1069_p13 = pneg %p1068_p12 }
 0x22e   : > { %p1075_p4 = por %p1074_p3, %p1073_p2 }
 0x230   : > { %p1076_p7 = pnand %p1075_p4, %p1069_p13 }
 0x232   : > { %1079 = shalt.err (!%p1076_p7)
}
 0x233   : > { %961 = dma.vmem_to_hbm [thread:$0]  (%p1209_p5), %s1335_s18, 32, %s1333_s19, %s731_s12  }
 0x234 PF: > { %p971_p8 = scmp.ge.s32.totalorder %s1118_s30, 2  ;;  %s769_s22 = sand.u32 1, %s1106_s27  }
 0x235   : > { %s770_s20 = scalar_lea.sflag [#allocation3], %s769_s22 }
 0x236   : > { %p965_p9 = pnand %p971_p8, %p1213_p6 }
 0x238   : > { %1097 = dma.done.wait (!%p965_p9), %s770_s20, 32  }
 0x239   : > { %1099 = vsyncadd (!%p965_p9), %s770_s20, 4294967264  ;;  %s779_s9 = scalar_lea.sflag [#allocation5], %s769_s22 }
 0x23a   : > { %1101 = dma.done.wait (!%p965_p9), %s779_s9, 32  }
 0x23b   : > { %1103 = vsyncadd (!%p965_p9), %s779_s9, 4294967264  ;;  %p22_p5 = scmp.ge.s32.totalorder %s1196_s11, 4   ;;  %s1390_s27 = smov %s1110_s28 }
 0x23c   : > { %s1391_s28 = smov %s1114_s29  ;;  %s1392_s29 = smov %s1207_s14 }
 0x23d   : > { %s1393_s30 = smov %s1196_s11  ;;  %24 = sbr.rel (!%p22_p5) target bundleno = 5 (0x5), region = 103 }
 0x244   :  { %784 = vsyncpa [#allocation3], 1 }
 0x245   :  { %786 = vsyncpa [#allocation3 + $0x1], 1 }
 0x246   :  { %787 = vsyncpa [#allocation5], 1 }
 0x247   :  { %789 = vsyncpa [#allocation5 + $0x1], 1 }

</bundles_post_ra>
